<compile_context>
chip_gen: v5e
topology: v5e:2x2
jax: 0.10.0
libtpu: 0.0.40
codegen_flags: <defaults>
</compile_context>

<pallas_src>
import functools

import jax
import jax.numpy as jnp
from jax.experimental import pallas as pl
from jax.experimental.pallas import tpu as pltpu

IN_FEATURES = 28 * 28   # 784 — kept unpadded in HBM
H1 = 128                # fc1 out (already lane-dense)
H2_PAD = 128            # fc2 out 64 -> 128
OUT_PAD = 128           # fc3 out 10 -> 128 (lane-dense unmasked store)
OUT_REAL = 10


def _round_up(n, m):
    return ((n + m - 1) // m) * m


def mlp_kernel(x_ref, w1_ref, b1_ref, w2_ref, b2_ref, w3_ref, b3_ref, o_ref):
    # f32 tile from HBM -> bf16 in VMEM (avoids an extra HBM pre-pass).
    x = x_ref[...].astype(jnp.bfloat16)
    # fc1 + ReLU (bf16 MXU inputs, f32 accumulation, f32 epilogue)
    h1 = jnp.dot(x, w1_ref[...], preferred_element_type=jnp.float32)
    h1 = jnp.maximum(h1 + b1_ref[...], 0.0)
    # fc2 + ReLU
    h2 = jnp.dot(h1.astype(jnp.bfloat16), w2_ref[...],
                 preferred_element_type=jnp.float32)
    h2 = jnp.maximum(h2 + b2_ref[...], 0.0)
    # fc3 logits, padded to 128 lanes, written back as bf16 (half the bytes)
    out = jnp.dot(h2.astype(jnp.bfloat16), w3_ref[...],
                  preferred_element_type=jnp.float32)
    o_ref[...] = (out + b3_ref[...]).astype(o_ref.dtype)


def prepare_params(params):
    """One-time pad + bf16 cast of weights/biases (hoisted out of the hot path)."""
    w1, b1, w2, b2, w3, b3 = params
    w1_p = w1.astype(jnp.bfloat16)                                    # (784,128)
    b1_p = b1.reshape(1, -1).astype(jnp.float32)                      # (1,128)
    w2_p = jnp.pad(w2, ((0, 0), (0, H2_PAD - w2.shape[1]))
                   ).astype(jnp.bfloat16)                             # (128,128)
    b2_p = jnp.pad(b2.reshape(1, -1),
                   ((0, 0), (0, H2_PAD - b2.shape[1]))).astype(jnp.float32)
    w3_p = jnp.pad(w3, ((0, H2_PAD - w3.shape[0]), (0, OUT_PAD - w3.shape[1]))
                   ).astype(jnp.bfloat16)                             # (128,128)
    b3_p = jnp.pad(b3.reshape(1, -1),
                   ((0, 0), (0, OUT_PAD - b3.shape[1]))).astype(jnp.float32)
    return (w1_p, b1_p, w2_p, b2_p, w3_p, b3_p)


def _choose_tiling(B, block_b):
    """Pick (TB, nb, Bp): >=2 grid steps when the batch can be split into
    8-row tiles (v7x dual TC), tile sized to minimize batch padding, capped at
    block_b rows so 2x(TB,784)f32 input buffers stay far below VMEM limits."""
    nb = max(pl.cdiv(B, block_b), 2 if B >= 16 else 1)
    tb = _round_up(pl.cdiv(B, nb), 8)
    nb = pl.cdiv(B, tb)
    return tb, nb, nb * tb


@functools.partial(jax.jit, static_argnames=("block_b",))
def mlp_forward(x_nchw, prepared, *, block_b=512):
    """x_nchw: (B, 1, 28, 28) float32 -> logits (B, 10) float32."""
    w1_p, b1_p, w2_p, b2_p, w3_p, b3_p = prepared
    B = x_nchw.shape[0]
    x = x_nchw.reshape(B, IN_FEATURES)   # metadata-only reshape, no HBM pass

    TB, nb, Bp = _choose_tiling(B, block_b)
    if Bp != B:
        x = jnp.pad(x, ((0, Bp - B), (0, 0)))

    resident = lambda shape: pl.BlockSpec(shape, lambda i: (0,) * len(shape))

    out_padded = pl.pallas_call(
        mlp_kernel,
        out_shape=jax.ShapeDtypeStruct((Bp, OUT_PAD), jnp.bfloat16),
        grid=(nb,),
        in_specs=[
            pl.BlockSpec((TB, IN_FEATURES), lambda i: (i, 0)),   # x: f32, K unpadded
            resident((IN_FEATURES, H1)), resident((1, H1)),      # w1, b1 (VMEM-resident)
            resident((H1, H2_PAD)),      resident((1, H2_PAD)),  # w2, b2
            resident((H2_PAD, OUT_PAD)), resident((1, OUT_PAD)), # w3, b3
        ],
        out_specs=pl.BlockSpec((TB, OUT_PAD), lambda i: (i, 0)),
        compiler_params=pltpu.CompilerParams(
            dimension_semantics=("parallel",)),
    )(x, w1_p, b1_p, w2_p, b2_p, w3_p, b3_p)

    # drop batch padding and the zero logit columns, upcast once
    return out_padded[:B, :OUT_REAL].astype(jnp.float32)


def init_params(key):
    """Deterministic init with nn.Linear shapes (stored transposed: (in, out))."""
    def linear(k, fan_in, fan_out):
        kw, kb = jax.random.split(k)
        bound = 1.0 / (fan_in ** 0.5)  # same bound family as PyTorch Linear default
        w = jax.random.uniform(kw, (fan_in, fan_out), jnp.float32, -bound, bound)
        b = jax.random.uniform(kb, (1, fan_out), jnp.float32, -bound, bound)
        return w, b

    k1, k2, k3 = jax.random.split(key, 3)
    w1, b1 = linear(k1, 28 * 28, 128)
    w2, b2 = linear(k2, 128, 64)
    w3, b3 = linear(k3, 64, 10)
    return (w1, b1, w2, b2, w3, b3)


def ref_forward(x_nchw, params):
    """Plain-JAX reference mirroring the kernel's bf16/f32 mixed precision."""
    w1, b1, w2, b2, w3, b3 = params
    B = x_nchw.shape[0]
    xf = x_nchw.reshape(B, 28 * 28).astype(jnp.bfloat16)
    h1 = jnp.maximum(jnp.dot(xf, w1.astype(jnp.bfloat16),
                             preferred_element_type=jnp.float32) + b1, 0.0)
    h2 = jnp.maximum(jnp.dot(h1.astype(jnp.bfloat16), w2.astype(jnp.bfloat16),
                             preferred_element_type=jnp.float32) + b2, 0.0)
    return jnp.dot(h2.astype(jnp.bfloat16), w3.astype(jnp.bfloat16),
                   preferred_element_type=jnp.float32) + b3


if __name__ == "__main__":
    key = jax.random.PRNGKey(0)
    kx, kp = jax.random.split(key)

    B = 8
    x = jax.random.normal(kx, (B, 1, 28, 28), jnp.float32)  # NCHW like MNIST tensors
    params = init_params(kp)
    prepared = prepare_params(params)          # one-time weight pad/cast

    logits = mlp_forward(x, prepared)
    logits = jax.block_until_ready(logits)

    ref = ref_forward(x, params)
    assert logits.shape == (B, 10)
    assert jnp.allclose(logits, ref, atol=5e-2, rtol=5e-2), (
        float(jnp.max(jnp.abs(logits - ref))))

    print("KERNEL_OK")
</pallas_src>

<mosaic_0001>
module attributes {stable_mosaic.version = 11 : i64} {
  func.func @mlp_kernel(%arg0: i32, %arg1: memref<8x784xf32, #tpu.memory_space<vmem>>, %arg2: memref<784x128xbf16, #tpu.memory_space<vmem>>, %arg3: memref<1x128xf32, #tpu.memory_space<vmem>>, %arg4: memref<128x128xbf16, #tpu.memory_space<vmem>>, %arg5: memref<1x128xf32, #tpu.memory_space<vmem>>, %arg6: memref<128x128xbf16, #tpu.memory_space<vmem>>, %arg7: memref<1x128xf32, #tpu.memory_space<vmem>>, %arg8: memref<8x128xbf16, #tpu.memory_space<vmem>>) attributes {dimension_semantics = [#tpu.dimension_semantics<parallel>], iteration_bounds = array<i64: 1>, scalar_prefetch = 0 : i64, scratch_operands = 0 : i64, tpu.core_type = #tpu.core_type<tc>, window_params = [{transform_indices = @transform_0, window_bounds = array<i64: 8, 784>}, {pipeline_mode = #tpu.pipeline_mode<synchronous>, transform_indices = @transform_1, window_bounds = array<i64: 784, 128>}, {pipeline_mode = #tpu.pipeline_mode<synchronous>, transform_indices = @transform_2, window_bounds = array<i64: 1, 128>}, {pipeline_mode = #tpu.pipeline_mode<synchronous>, transform_indices = @transform_3, window_bounds = array<i64: 128, 128>}, {pipeline_mode = #tpu.pipeline_mode<synchronous>, transform_indices = @transform_4, window_bounds = array<i64: 1, 128>}, {pipeline_mode = #tpu.pipeline_mode<synchronous>, transform_indices = @transform_5, window_bounds = array<i64: 128, 128>}, {pipeline_mode = #tpu.pipeline_mode<synchronous>, transform_indices = @transform_6, window_bounds = array<i64: 1, 128>}, {transform_indices = @transform_7, window_bounds = array<i64: 8, 128>}]} {
    %c0 = arith.constant 0 : index
    %c0_0 = arith.constant 0 : index
    %0 = vector.load %arg1[%c0, %c0_0] : memref<8x784xf32, #tpu.memory_space<vmem>>, vector<8x784xf32>
    %1 = arith.truncf %0 : vector<8x784xf32> to vector<8x784xbf16>
    %c0_1 = arith.constant 0 : index
    %c0_2 = arith.constant 0 : index
    %2 = vector.load %arg2[%c0_1, %c0_2] : memref<784x128xbf16, #tpu.memory_space<vmem>>, vector<784x128xbf16>
    %cst = arith.constant dense<0.000000e+00> : vector<8x128xf32>
    %3 = tpu.matmul %1, %2, %cst {dimension_numbers = #tpu.dot_dimension_numbers<[1], [0], [0], [1], [0, 0, 1, 1], [], []>} : vector<8x784xbf16>, vector<784x128xbf16>, vector<8x128xf32> -> vector<8x128xf32>
    %c0_3 = arith.constant 0 : index
    %c0_4 = arith.constant 0 : index
    %4 = vector.load %arg3[%c0_3, %c0_4] : memref<1x128xf32, #tpu.memory_space<vmem>>, vector<1x128xf32>
    %5 = vector.broadcast %4 : vector<1x128xf32> to vector<8x128xf32>
    %6 = arith.addf %3, %5 : vector<8x128xf32>
    %cst_5 = arith.constant 0.000000e+00 : f32
    %7 = vector.broadcast %cst_5 : f32 to vector<8x128xf32>
    %8 = arith.maximumf %6, %7 : vector<8x128xf32>
    %9 = arith.truncf %8 : vector<8x128xf32> to vector<8x128xbf16>
    %c0_6 = arith.constant 0 : index
    %c0_7 = arith.constant 0 : index
    %10 = vector.load %arg4[%c0_6, %c0_7] : memref<128x128xbf16, #tpu.memory_space<vmem>>, vector<128x128xbf16>
    %cst_8 = arith.constant dense<0.000000e+00> : vector<8x128xf32>
    %11 = tpu.matmul %9, %10, %cst_8 {dimension_numbers = #tpu.dot_dimension_numbers<[1], [0], [0], [1], [0, 0, 1, 1], [], []>} : vector<8x128xbf16>, vector<128x128xbf16>, vector<8x128xf32> -> vector<8x128xf32>
    %c0_9 = arith.constant 0 : index
    %c0_10 = arith.constant 0 : index
    %12 = vector.load %arg5[%c0_9, %c0_10] : memref<1x128xf32, #tpu.memory_space<vmem>>, vector<1x128xf32>
    %13 = vector.broadcast %12 : vector<1x128xf32> to vector<8x128xf32>
    %14 = arith.addf %11, %13 : vector<8x128xf32>
    %cst_11 = arith.constant 0.000000e+00 : f32
    %15 = vector.broadcast %cst_11 : f32 to vector<8x128xf32>
    %16 = arith.maximumf %14, %15 : vector<8x128xf32>
    %17 = arith.truncf %16 : vector<8x128xf32> to vector<8x128xbf16>
    %c0_12 = arith.constant 0 : index
    %c0_13 = arith.constant 0 : index
    %18 = vector.load %arg6[%c0_12, %c0_13] : memref<128x128xbf16, #tpu.memory_space<vmem>>, vector<128x128xbf16>
    %cst_14 = arith.constant dense<0.000000e+00> : vector<8x128xf32>
    %19 = tpu.matmul %17, %18, %cst_14 {dimension_numbers = #tpu.dot_dimension_numbers<[1], [0], [0], [1], [0, 0, 1, 1], [], []>} : vector<8x128xbf16>, vector<128x128xbf16>, vector<8x128xf32> -> vector<8x128xf32>
    %c0_15 = arith.constant 0 : index
    %c0_16 = arith.constant 0 : index
    %20 = vector.load %arg7[%c0_15, %c0_16] : memref<1x128xf32, #tpu.memory_space<vmem>>, vector<1x128xf32>
    %21 = vector.broadcast %20 : vector<1x128xf32> to vector<8x128xf32>
    %22 = arith.addf %19, %21 : vector<8x128xf32>
    %23 = arith.truncf %22 : vector<8x128xf32> to vector<8x128xbf16>
    %c0_17 = arith.constant 0 : index
    %c0_18 = arith.constant 0 : index
    %24 = vector.load %arg8[%c0_17, %c0_18] : memref<8x128xbf16, #tpu.memory_space<vmem>>, vector<8x128xbf16>
    tpu.vector_store %arg8[%c0_17, %c0_18], %23 {strides = array<i32>} : memref<8x128xbf16, #tpu.memory_space<vmem>>, vector<8x128xbf16>,
    return
  }
  func.func @transform_0(%arg0: i32) -> (i32, i32) {
    %c0_i32 = arith.constant 0 : i32
    %c0_i32_0 = arith.constant 0 : i32
    return %arg0, %c0_i32 : i32, i32
  }
  func.func @transform_1(%arg0: i32) -> (i32, i32) {
    %c0_i32 = arith.constant 0 : i32
    %c0_i32_0 = arith.constant 0 : i32
    %c0_i32_1 = arith.constant 0 : i32
    return %c0_i32, %c0_i32_0 : i32, i32
  }
  func.func @transform_2(%arg0: i32) -> (i32, i32) {
    %c0_i32 = arith.constant 0 : i32
    %c0_i32_0 = arith.constant 0 : i32
    %c0_i32_1 = arith.constant 0 : i32
    return %c0_i32, %c0_i32_0 : i32, i32
  }
  func.func @transform_3(%arg0: i32) -> (i32, i32) {
    %c0_i32 = arith.constant 0 : i32
    %c0_i32_0 = arith.constant 0 : i32
    %c0_i32_1 = arith.constant 0 : i32
    return %c0_i32, %c0_i32_0 : i32, i32
  }
  func.func @transform_4(%arg0: i32) -> (i32, i32) {
    %c0_i32 = arith.constant 0 : i32
    %c0_i32_0 = arith.constant 0 : i32
    %c0_i32_1 = arith.constant 0 : i32
    return %c0_i32, %c0_i32_0 : i32, i32
  }
  func.func @transform_5(%arg0: i32) -> (i32, i32) {
    %c0_i32 = arith.constant 0 : i32
    %c0_i32_0 = arith.constant 0 : i32
    %c0_i32_1 = arith.constant 0 : i32
    return %c0_i32, %c0_i32_0 : i32, i32
  }
  func.func @transform_6(%arg0: i32) -> (i32, i32) {
    %c0_i32 = arith.constant 0 : i32
    %c0_i32_0 = arith.constant 0 : i32
    %c0_i32_1 = arith.constant 0 : i32
    return %c0_i32, %c0_i32_0 : i32, i32
  }
  func.func @transform_7(%arg0: i32) -> (i32, i32) {
    %c0_i32 = arith.constant 0 : i32
    %c0_i32_0 = arith.constant 0 : i32
    return %arg0, %c0_i32 : i32, i32
  }
}

</mosaic_0001>

<bundles_post_ra>
// kernel: mlp_forward.1
= control target key start
LH: loop header
LB: loop body
LE: loop exit
PB: predicated region body
PF: predicated region fallthrough
CT: control target
= control target key end

     0   :  { %vm437_vm0 = vcmask 130048   ;;  %s1301_s1 = inlined_call_operand.vmem [shape: bf16[784,128], index: 1, kind: input, shape index: {}]   ;;  %s1302_s2 = inlined_call_operand.vmem [shape: f32[1,128], index: 2, kind: input, shape index: {}]   ;;  %s1303_s0 = inlined_call_operand.vmem [shape: f32[8,784], index: 0, kind: input, shape index: {}]   ;;  %s1304_s4 = inlined_call_operand.vmem [shape: f32[1,128], index: 4, kind: input, shape index: {}]   ;;  %s1305_s3 = inlined_call_operand.vmem [shape: bf16[128,128], index: 3, kind: input, shape index: {}]   ;;  %s1306_s5 = inlined_call_operand.vmem [shape: bf16[128,128], index: 5, kind: input, shape index: {}]   ;;  %s1307_s6 = inlined_call_operand.vmem [shape: f32[1,128], index: 6, kind: input, shape index: {}]   ;;  %s1308_s7 = inlined_call_operand.vmem [shape: bf16[8,128], index: 7, kind: output, shape index: {}]  }
   0x1   :  { %v972_v0 = vld [vmem:[%s1301_s1 + $0x38] sm:$0xff]  ;;  %v971_v3 = vld [vmem:[%s1301_s1 + $0x30] sm:$0xff]  ;;  %v970_v8 = vld [vmem:[%s1301_s1 + $0x28] sm:$0xff] }
   0x2   :  { %v980_v1 = vld [vmem:[%s1301_s1 + $0x78] sm:$0xff]  ;;  %441 = vmatpush.bf16.msra.mxu0 %v972_v0  ;;  %v979_v4 = vld [vmem:[%s1301_s1 + $0x70] sm:$0xff]  ;;  %v978_v9 = vld [vmem:[%s1301_s1 + $0x68] sm:$0xff] }
   0x3   :  { %v988_v2 = vld [vmem:[%s1301_s1 + $0xb8] sm:$0xff]  ;;  %454 = vmatpush.bf16.msra.mxu1 %v980_v1  ;;  %v987_v5 = vld [vmem:[%s1301_s1 + $0xb0] sm:$0xff]  ;;  %v986_v10 = vld [vmem:[%s1301_s1 + $0xa8] sm:$0xff] }
   0x4   :  { %467 = vmatpush.bf16.msra.mxu2 %v988_v2  ;;  %v996_v6 = vld [vmem:[%s1301_s1 + $0xf8] sm:$0xff]  ;;  %v995_v7 = vld [vmem:[%s1301_s1 + $0xf0] sm:$0xff]  ;;  %v994_v11 = vld [vmem:[%s1301_s1 + $0xe8] sm:$0xff] }
   0x5   :  { %480 = vmatpush.bf16.msra.mxu3 %v996_v6  ;;  %v969_v12 = vld [vmem:[%s1301_s1 + $0x20] sm:$0xff]  ;;  %v968_v16 = vld [vmem:[%s1301_s1 + $0x18] sm:$0xff]  ;;  %v967_v20 = vld [vmem:[%s1301_s1 + $0x10] sm:$0xff] }
   0x6   :  { %442 = vmatpush.bf16.msra.mxu0 %v971_v3  ;;  %v977_v13 = vld [vmem:[%s1301_s1 + $0x60] sm:$0xff]  ;;  %v976_v17 = vld [vmem:[%s1301_s1 + $0x58] sm:$0xff]  ;;  %v975_v21 = vld [vmem:[%s1301_s1 + $0x50] sm:$0xff] }
   0x7   :  { %455 = vmatpush.bf16.msra.mxu1 %v979_v4  ;;  %v985_v14 = vld [vmem:[%s1301_s1 + $0xa0] sm:$0xff]  ;;  %v984_v18 = vld [vmem:[%s1301_s1 + $0x98] sm:$0xff]  ;;  %v983_v22 = vld [vmem:[%s1301_s1 + $0x90] sm:$0xff] }
   0x8   :  { %468 = vmatpush.bf16.msra.mxu2 %v987_v5  ;;  %v993_v15 = vld [vmem:[%s1301_s1 + $0xe0] sm:$0xff]  ;;  %v992_v19 = vld [vmem:[%s1301_s1 + $0xd8] sm:$0xff]  ;;  %v991_v23 = vld [vmem:[%s1301_s1 + $0xd0] sm:$0xff] }
   0x9   :  { %481 = vmatpush.bf16.msra.mxu3 %v995_v7  ;;  %v966_v24 = vld [vmem:[%s1301_s1 + $0x8] sm:$0xff]  ;;  %v965_v27 = vld [vmem:[%s1301_s1] sm:$0xff]  ;;  %v1004_v32 = vld [vmem:[%s1301_s1 + $0x138] sm:$0xff] }
   0xa   :  { %443 = vmatpush.bf16.msra.mxu0 %v970_v8  ;;  %v974_v25 = vld [vmem:[%s1301_s1 + $0x48] sm:$0xff]  ;;  %v973_v29 = vld [vmem:[%s1301_s1 + $0x40] sm:$0xff]  ;;  %v1012_v33 = vld [vmem:[%s1301_s1 + $0x178] sm:$0xff] }
   0xb   :  { %456 = vmatpush.bf16.msra.mxu1 %v978_v9  ;;  %v982_v26 = vld [vmem:[%s1301_s1 + $0x88] sm:$0xff]  ;;  %v27_v30 = vld [vmem:[%s1303_s0] sm:$0xff]  ;;  %v29_v35 = vld [vmem:[%s1303_s0 + $0x10] sm:$0xff] }
   0xc   :  { %469 = vmatpush.bf16.msra.mxu2 %v986_v10  ;;  %v990_v28 = vld [vmem:[%s1301_s1 + $0xc8] sm:$0xff]  ;;  %v981_v34 = vld [vmem:[%s1301_s1 + $0x80] sm:$0xff]  ;;  %v34_v36 = vpack.c.bf16 %v27_v30, %v27_v30  ;;  %v30_v40 = vld [vmem:[%s1303_s0 + $0x18] sm:$0xff]  ;;  %v36_v43 = vpack.c.bf16 %v29_v35, %v29_v35 }
   0xd   :  { %482 = vmatpush.bf16.msra.mxu3 %v994_v11  ;;  %v28_v31 = vld [vmem:[%s1303_s0 + $0x8] sm:$0xff]  ;;  %v989_v38 = vld [vmem:[%s1301_s1 + $0xc0] sm:$0xff]  ;;  %v1003_v41 = vld [vmem:[%s1301_s1 + $0x130] sm:$0xff]  ;;  %v37_v44 = vpack.c.bf16 %v30_v40, %v30_v40 }
   0xe   :  { %444 = vmatpush.bf16.msra.mxu0 %v969_v12  ;;  %v35_v37 = vpack.c.bf16 %v28_v31, %v28_v31  ;;  %v1013_v39 = vld [vmem:[%s1301_s1 + $0x180] sm:$0xff]  ;;  %v1011_v42 = vld [vmem:[%s1301_s1 + $0x170] sm:$0xff]  ;;  %v1002_v45 = vld [vmem:[%s1301_s1 + $0x128] sm:$0xff] }
   0xf   :  { %457 = vmatpush.bf16.msra.mxu1 %v977_v13  ;;  %v1010_v46 = vld [vmem:[%s1301_s1 + $0x168] sm:$0xff]  ;;  %v1001_v47 = vld [vmem:[%s1301_s1 + $0x120] sm:$0xff]  ;;  %v1000_v49 = vld [vmem:[%s1301_s1 + $0x118] sm:$0xff] }
  0x10   :  { %470 = vmatpush.bf16.msra.mxu2 %v985_v14  ;;  %v1009_v48 = vld [vmem:[%s1301_s1 + $0x160] sm:$0xff]  ;;  %v1008_v50 = vld [vmem:[%s1301_s1 + $0x158] sm:$0xff]  ;;  %v33_v51 = vld [vmem:[%s1303_s0 + $0x30] sm:$0xff] }
  0x11   :  { %483 = vmatpush.bf16.msra.mxu3 %v993_v15  ;;  %v999_v52 = vld [vmem:[%s1301_s1 + $0x110] sm:$0xff]  ;;  %v40_v54 = vpack.c.bf16 %v33_v51, %v33_v51  ;;  %v998_v55 = vld [vmem:[%s1301_s1 + $0x108] sm:$0xff]  ;;  %v997_v57 = vld [vmem:[%s1301_s1 + $0x100] sm:$0xff] }
  0x12   :  { %445 = vmatpush.bf16.msra.mxu0 %v968_v16  ;;  %v1007_v53 = vld [vmem:[%s1301_s1 + $0x150] sm:$0xff]  ;;  %v1006_v56 = vld [vmem:[%s1301_s1 + $0x148] sm:$0xff]  ;;  %v1005_v58 = vld [vmem:[%s1301_s1 + $0x140] sm:$0xff] }
  0x13   :  { %458 = vmatpush.bf16.msra.mxu1 %v976_v17  ;;  %v31_v59 = vld [vmem:[%s1303_s0 + $0x20] sm:$0xff]  ;;  %v32_v60 = vld [vmem:[%s1303_s0 + $0x28] sm:$0xff]  ;;  %v1021_v63 = vld [vmem:[%s1305_s3 + $0x38] sm:$0xff] }
  0x14   :  { %471 = vmatpush.bf16.msra.mxu2 %v984_v18  ;;  %v38_v61 = vpack.c.bf16 %v31_v59, %v31_v59  ;;  %v39_v62 = vpack.c.bf16 %v32_v60, %v32_v60  ;;  %v1020_v0 = vld [vmem:[%s1305_s3 + $0x30] sm:$0xff]  ;;  %v1019_v1 = vld [vmem:[%s1305_s3 + $0x28] sm:$0xff]  ;;  %v1018_v2 = vld [vmem:[%s1305_s3 + $0x20] sm:$0xff] }
  0x15   :  { %484 = vmatpush.bf16.msra.mxu3 %v992_v19  ;;  %v1017_v3 = vld [vmem:[%s1305_s3 + $0x18] sm:$0xff]  ;;  %v1016_v4 = vld [vmem:[%s1305_s3 + $0x10] sm:$0xff]  ;;  %v1015_v5 = vld [vmem:[%s1305_s3 + $0x8] sm:$0xff] }
  0x16   :  { %446 = vmatpush.bf16.msra.mxu0 %v967_v20  ;;  %v1014_v8 = vld [vmem:[%s1305_s3] sm:$0xff]  ;;  %v1029_v11 = vld [vmem:[%s1306_s5 + $0x38] sm:$0xff]  ;;  %v1028_v14 = vld [vmem:[%s1306_s5 + $0x30] sm:$0xff] }
  0x17   :  { %459 = vmatpush.bf16.msra.mxu1 %v975_v21  ;;  %v1030_v15 = vld [vmem:[%s1302_s2] ss:$0 sm:$0xff]  ;;  %v1027_v16 = vld [vmem:[%s1306_s5 + $0x28] sm:$0xff] }
  0x18   :  { %472 = vmatpush.bf16.msra.mxu2 %v983_v22  ;;  %v1026_v20 = vld [vmem:[%s1306_s5 + $0x20] sm:$0xff]  ;;  %v1025_v22 = vld [vmem:[%s1306_s5 + $0x18] sm:$0xff] }
  0x19   :  { %485 = vmatpush.bf16.msra.mxu3 %v991_v23 }
  0x1a   :  { %447 = vmatpush.bf16.msra.mxu0 %v966_v24 }
  0x1b   :  { %460 = vmatpush.bf16.msra.mxu1 %v974_v25  ;;  %v1024_v25 = vld [vmem:[%s1306_s5 + $0x10] sm:$0xff] }
  0x1c   :  { %473 = vmatpush.bf16.msra.mxu2 %v982_v26 }
  0x1d   :  { %486 = vmatpush.bf16.msra.mxu3 %v990_v28 }
  0x1e   :  { %448 = vmatpush.bf16.msra.mxu0 %v965_v27 }
  0x1f   :  { %461 = vmatpush.bf16.msra.mxu1 %v973_v29 }
  0x20   :  { %474 = vmatpush.bf16.msra.mxu2 %v981_v34 }
  0x21   :  { %449 = vmatmul.bf16.vlgmr.msra.gmra.mxu0 %v34_v36  ;;  %487 = vmatpush.bf16.msra.mxu3 %v989_v38  ;;  %v1022_v38 = vld [vmem:[%s1306_s5] sm:$0xff] }
  0x22   :  { %493 = vmatpush.bf16.msrb.mxu0 %v1004_v32  ;;  %462 = vmatmul.bf16.vlgmr.msra.gmra.mxu1 %v35_v37  ;;  %v1023_v37 = vld [vmem:[%s1306_s5 + $0x8] sm:$0xff] }
  0x23   :  { %506 = vmatpush.bf16.msrb.mxu1 %v1012_v33  ;;  %475 = vmatmul.bf16.vlgmr.msra.gmra.mxu2 %v36_v43 }
  0x24   :  { %526 = vmatpush.bf16.msrb.mxu2 %v1013_v39  ;;  %488 = vmatmul.bf16.vlgmr.msra.gmra.mxu3 %v37_v44  ;;  %v1031_v39 = vld [vmem:[%s1304_s4] ss:$0 sm:$0xff] }
  0x25   :  { %602 = vmatpush.bf16.msrb.mxu3 %v1021_v63 }
  0x26   :  { %494 = vmatpush.bf16.msrb.mxu0 %v1003_v41 }
  0x27   :  { %507 = vmatpush.bf16.msrb.mxu1 %v1011_v42 }
  0x28   :  { %685 = vmatpush.bf16.msra.mxu2 %v1029_v11 }
  0x29   :  { %603 = vmatpush.bf16.msrb.mxu3 %v1020_v0 }
  0x2a   :  { %495 = vmatpush.bf16.msrb.mxu0 %v1002_v45  ;;  %v1032_v45 = vld [vmem:[%s1307_s6] ss:$0 sm:$0xff] }
  0x2b   :  { %508 = vmatpush.bf16.msrb.mxu1 %v1010_v46 }
  0x2c   :  { %686 = vmatpush.bf16.msra.mxu2 %v1028_v14 }
  0x2d   :  { %604 = vmatpush.bf16.msrb.mxu3 %v1019_v1 }
  0x2e   :  { %496 = vmatpush.bf16.msrb.mxu0 %v1001_v47 }
  0x2f   :  { %509 = vmatpush.bf16.msrb.mxu1 %v1009_v48 }
  0x30   :  { %687 = vmatpush.bf16.msra.mxu2 %v1027_v16 }
  0x31   :  { %605 = vmatpush.bf16.msrb.mxu3 %v1018_v2 }
  0x32   :  { %497 = vmatpush.bf16.msrb.mxu0 %v1000_v49 }
  0x33   :  { %510 = vmatpush.bf16.msrb.mxu1 %v1008_v50  ;;  %900 = vmatmul.msk.bf16.vlgmr.msrb.gmra.mxu2 %vm437_vm0, %v40_v54 }
  0x34   :  { %688 = vmatpush.bf16.msra.mxu2 %v1026_v20 }
  0x35   :  { %606 = vmatpush.bf16.msrb.mxu3 %v1017_v3 }
  0x36   :  { %498 = vmatpush.bf16.msrb.mxu0 %v999_v52 }
  0x37   :  { %511 = vmatpush.bf16.msrb.mxu1 %v1007_v53 }
  0x38   :  { %689 = vmatpush.bf16.msra.mxu2 %v1025_v22 }
  0x39   :  { %607 = vmatpush.bf16.msrb.mxu3 %v1016_v4 }
  0x3a   :  { %499 = vmatpush.bf16.msrb.mxu0 %v998_v55 }
  0x3b   :  { %512 = vmatpush.bf16.msrb.mxu1 %v1006_v56 }
  0x3c   :  { %690 = vmatpush.bf16.msra.mxu2 %v1024_v25 }
  0x3d   :  { %608 = vmatpush.bf16.msrb.mxu3 %v1015_v5 }
  0x3e   :  { %500 = vmatpush.bf16.msrb.mxu0 %v997_v57 }
  0x3f   :  { %513 = vmatpush.bf16.msrb.mxu1 %v1005_v58 }
  0x40   :  { %691 = vmatpush.bf16.msra.mxu2 %v1023_v37 }
  0x41   :  { %501 = vmatmul.bf16.vlgmr.msrb.gmra.mxu0 %v38_v61  ;;  %609 = vmatpush.bf16.msrb.mxu3 %v1014_v8 }
  0x42   :  { %514 = vmatmul.bf16.vlgmr.msrb.gmra.mxu1 %v39_v62 }
  0x44   :  { %692 = vmatpush.bf16.msra.mxu2 %v1022_v38 }
  0x9e   :  { %v450_v6 = vpop.f32.mrf.mxu0 }
  0x9f   :  { %v463_v7 = vpop.f32.mrf.mxu1  ;;  %v451_v17 = vadd.f32 %v1030_v15, %v450_v6 }
  0xa1   :  { %v464_v21 = vadd.f32 %v463_v7, %v451_v17 }
  0xa6   :  { %v452_v9 = vpop.f32.mrf.mxu0  ;;  %v476_v12 = vpop.f32.mrf.mxu2 }
  0xa7   :  { %v465_v10 = vpop.f32.mrf.mxu1  ;;  %v489_v13 = vpop.f32.mrf.mxu3  ;;  %v477_v23 = vadd.f32 %v476_v12, %v464_v21 }
  0xa9   :  { %v490_v26 = vadd.f32 %v489_v13, %v477_v23 }
  0xae   :  { %v478_v18 = vpop.f32.mrf.mxu2 }
  0xaf   :  { %v491_v19 = vpop.f32.mrf.mxu3 }
  0xb6   :  { %v528_v24 = vpop.f32.mrf.mxu2 }
  0xbe   :  { %v502_v27 = vpop.f32.mrf.mxu0  ;;  %v530_v31 = vpop.f32.mrf.mxu2 }
  0xbf   :  { %v515_v28 = vpop.f32.mrf.mxu1  ;;  %v503_v29 = vadd.f32 %v502_v27, %v490_v26 }
  0xc1   :  { %v516_v30 = vadd.f32 %v515_v28, %v503_v29 }
  0xc3   :  { %v529_v32 = vadd.f32 %v528_v24, %v516_v30 }
  0xc5   :  { %v532_v33 = vmax.f32 %v529_v32, 0.0 }
  0xc6   :  { %v504_v34 = vpop.f32.mrf.mxu0 }
  0xc7   :  { %v517_v35 = vpop.f32.mrf.mxu1  ;;  %v533_v36 = vpack.c.bf16 %v532_v33, %v532_v33 }
  0xc9   :  { %610 = vmatmul.bf16.vlgmr.msrb.gmra.mxu3 %v533_v36 }
 0x14c   :  { %v611_v40 = vpop.f32.mrf.mxu3 }
 0x14d   :  { %v612_v41 = vadd.f32 %v1031_v39, %v611_v40 }
 0x14f   :  { %v615_v42 = vmax.f32 %v612_v41, 0.0 }
 0x151   :  { %v616_v43 = vpack.c.bf16 %v615_v42, %v615_v42 }
 0x153   :  { %693 = vmatmul.bf16.vlgmr.msra.gmra.mxu2 %v616_v43 }
 0x154   :  { %v613_v44 = vpop.f32.mrf.mxu3 }
 0x1d6   :  { %v694_v46 = vpop.f32.mrf.mxu2 }
 0x1d7   :  { %v695_v47 = vadd.f32 %v1032_v45, %v694_v46 }
 0x1d9   :  { %v698_v48 = vpack.c.bf16 %v695_v47, %v695_v47 }
 0x1db   :  { %699 = vst [vmem:[%s1308_s7] sm:$0xf] %v698_v48 }
 0x1de   :  { %v696_v49 = vpop.f32.mrf.mxu2 }

</bundles_post_ra>
